<compile_context>
chip_gen: v6e
topology: v6e:2x2x1
jax: 0.10.0
libtpu: 0.0.40
codegen_flags: <defaults>
</compile_context>

<pallas_src>
import functools

import jax
import jax.numpy as jnp
from jax.experimental import pallas as pl
from jax.experimental.pallas import tpu as pltpu


def _round_up(n, m):
    return ((n + m - 1) // m) * m


def two_layer_net_kernel(x_ref, w1t_ref, b1_ref, w2t_ref, b2_ref, o_ref):
    # x tile: (TILE_N, D_in). Normalization is pre-folded into w1t / b1.
    x = x_ref[...].astype(w1t_ref.dtype)
    # linear1 (+ folded norm): (TILE_N, D_in) @ (D_in, H_p) -> f32 (TILE_N, H_p)
    h = jnp.dot(x, w1t_ref[...], preferred_element_type=jnp.float32)
    h = jnp.tanh(h + b1_ref[...])                       # f32 elementwise (EUP)
    # linear2: (TILE_N, H_p) @ (H_p, D_out_p) -> f32 (TILE_N, D_out_p)
    y = jnp.dot(h.astype(w2t_ref.dtype), w2t_ref[...],
                preferred_element_type=jnp.float32)
    o_ref[...] = (y + b2_ref[...]).astype(o_ref.dtype)


def prepare_params(x_mean, x_stddev, w1, b1, w2, b2,
                   matmul_dtype=jnp.bfloat16):
    """Fold normalization into linear1, pad to lane width, transpose, cast.

    Done ONCE outside the hot call path so the weights are not rewritten in
    HBM on every forward call.
    """
    w1 = jnp.asarray(w1, jnp.float32)          # (H, D_in)
    b1 = jnp.asarray(b1, jnp.float32)          # (H,)
    w2 = jnp.asarray(w2, jnp.float32)          # (D_out, H)
    b2 = jnp.asarray(b2, jnp.float32)          # (D_out,)
    mean = jnp.asarray(x_mean, jnp.float32)    # (D_in,)
    inv_std = 1.0 / jnp.asarray(x_stddev, jnp.float32)

    H, D_in = w1.shape
    D_out = w2.shape[0]

    # ((x - mean)/std) @ w1.T + b1  ==  x @ w1_eff.T + b1_eff
    w1_eff = w1 * inv_std[None, :]             # (H, D_in)
    b1_eff = b1 - w1_eff @ mean                # (H,)

    # Pad H and D_out up to 128 lanes. Zero padding is exact: padded h columns
    # are tanh(0 + 0) = 0 and hit zero w2 rows; padded output columns are
    # sliced off by the caller.
    H_p = _round_up(H, 128)
    D_out_p = _round_up(D_out, 128)

    w1t_p = jnp.zeros((D_in, H_p), jnp.float32).at[:, :H].set(w1_eff.T)
    b1_p = jnp.zeros((1, H_p), jnp.float32).at[0, :H].set(b1_eff)
    w2t_p = jnp.zeros((H_p, D_out_p), jnp.float32).at[:H, :D_out].set(w2.T)
    b2_p = jnp.zeros((1, D_out_p), jnp.float32).at[0, :D_out].set(b2)

    # Matmul operands in matmul_dtype (bf16 by default, f32 accumulation);
    # biases stay f32 for the f32 elementwise path.
    return dict(
        w1t=w1t_p.astype(matmul_dtype),
        b1=b1_p,
        w2t=w2t_p.astype(matmul_dtype),
        b2=b2_p,
        d_out=D_out,
    )


def two_layer_net_apply(x, params, *, tile_n=512):
    """Apply the prepared TwoLayerNet to x of shape (N, D_in)."""
    x = jnp.asarray(x, jnp.float32)
    N, D_in = x.shape
    w1t, b1, w2t, b2 = params["w1t"], params["b1"], params["w2t"], params["b2"]
    D_out = params["d_out"]
    H_p = w1t.shape[1]
    D_out_p = w2t.shape[1]

    # Batch tile: multiple of 8 sublanes. Default 512 rows keeps the
    # double-buffered x/out footprint tiny even on v7x's 64 MiB VMEM while
    # amortizing the ~0.35us/step grid overhead.
    tile_n = max(8, min(tile_n, _round_up(N, 8)))
    N_p = _round_up(N, tile_n)
    if N_p != N:
        x = jnp.zeros((N_p, D_in), x.dtype).at[:N, :].set(x)

    grid = (N_p // tile_n,)
    out = pl.pallas_call(
        two_layer_net_kernel,
        out_shape=jax.ShapeDtypeStruct((N_p, D_out_p), jnp.float32),
        grid=grid,
        in_specs=[
            pl.BlockSpec((tile_n, D_in), lambda i: (i, 0)),   # x: batch-tiled
            pl.BlockSpec((D_in, H_p), lambda i: (0, 0)),      # w1t: resident
            pl.BlockSpec((1, H_p), lambda i: (0, 0)),         # b1:  resident
            pl.BlockSpec((H_p, D_out_p), lambda i: (0, 0)),   # w2t: resident
            pl.BlockSpec((1, D_out_p), lambda i: (0, 0)),     # b2:  resident
        ],
        out_specs=pl.BlockSpec((tile_n, D_out_p), lambda i: (i, 0)),
        compiler_params=pltpu.CompilerParams(
            dimension_semantics=("parallel",)),   # megacore split on v7x
    )(x, w1t, b1, w2t, b2)
    return out[:N, :D_out]


def two_layer_net(x, x_mean, x_stddev, w1, b1, w2, b2, *,
                  tile_n=512, matmul_dtype=jnp.bfloat16):
    """Convenience wrapper: prepare params + apply (prefer caching params)."""
    params = prepare_params(x_mean, x_stddev, w1, b1, w2, b2, matmul_dtype)
    return two_layer_net_apply(x, params, tile_n=tile_n)


if __name__ == "__main__":
    # Small shapes consistent with a two-layer MLP; N chosen so that tile_n=16
    # exercises a multi-step grid plus batch padding (40 -> 48).
    N, D_in, H, D_out = 40, 16, 32, 4

    key = jax.random.PRNGKey(0)
    kx, kw1, kb1, kw2, kb2 = jax.random.split(key, 5)

    x = jax.random.normal(kx, (N, D_in), dtype=jnp.float32)

    # nn.Linear shapes: weight (out, in), bias (out,)
    w1 = jax.random.normal(kw1, (H, D_in), dtype=jnp.float32) * 0.1
    b1 = jax.random.normal(kb1, (H,), dtype=jnp.float32) * 0.1
    w2 = jax.random.normal(kw2, (D_out, H), dtype=jnp.float32) * 0.1
    b2 = jax.random.normal(kb2, (D_out,), dtype=jnp.float32) * 0.1

    # self.x_mean / self.x_stddev are module attributes set from data;
    # derive them deterministically from x (per-feature statistics).
    x_mean = jnp.mean(x, axis=0)
    x_stddev = jnp.std(x, axis=0) + 1e-6

    # Plain-JAX reference of the PyTorch forward pass.
    xn = (x - x_mean[None, :]) / x_stddev[None, :]
    y_ref = jnp.tanh(xn @ w1.T + b1) @ w2.T + b2

    # 1) f32 matmuls: exact-semantics check (tight tolerance).
    params_f32 = prepare_params(x_mean, x_stddev, w1, b1, w2, b2,
                                matmul_dtype=jnp.float32)
    y_f32 = jax.block_until_ready(two_layer_net_apply(x, params_f32, tile_n=16))
    assert y_f32.shape == (N, D_out)
    assert jnp.allclose(y_f32, y_ref, atol=1e-5, rtol=1e-5)

    # 2) bf16 matmul operands, f32 accumulation (production config).
    params_bf16 = prepare_params(x_mean, x_stddev, w1, b1, w2, b2,
                                 matmul_dtype=jnp.bfloat16)
    apply_fn = jax.jit(functools.partial(two_layer_net_apply,
                                         params=params_bf16, tile_n=16))
    y_bf16 = jax.block_until_ready(apply_fn(x))
    assert y_bf16.shape == (N, D_out)
    assert jnp.allclose(y_bf16, y_ref, atol=5e-2, rtol=5e-2)

    print("KERNEL_OK")
</pallas_src>

<mosaic_0001>
module attributes {stable_mosaic.version = 11 : i64} {
  func.func @two_layer_net_kernel(%arg0: i32, %arg1: memref<16x16xf32, #tpu.memory_space<vmem>>, %arg2: memref<16x128xf32, #tpu.memory_space<vmem>>, %arg3: memref<1x128xf32, #tpu.memory_space<vmem>>, %arg4: memref<128x128xf32, #tpu.memory_space<vmem>>, %arg5: memref<1x128xf32, #tpu.memory_space<vmem>>, %arg6: memref<16x128xf32, #tpu.memory_space<vmem>>) attributes {dimension_semantics = [#tpu.dimension_semantics<parallel>], iteration_bounds = array<i64: 3>, scalar_prefetch = 0 : i64, scratch_operands = 0 : i64, tpu.core_type = #tpu.core_type<tc>, window_params = [{transform_indices = @transform_0, window_bounds = array<i64: 16, 16>}, {pipeline_mode = #tpu.pipeline_mode<synchronous>, transform_indices = @transform_1, window_bounds = array<i64: 16, 128>}, {pipeline_mode = #tpu.pipeline_mode<synchronous>, transform_indices = @transform_2, window_bounds = array<i64: 1, 128>}, {pipeline_mode = #tpu.pipeline_mode<synchronous>, transform_indices = @transform_3, window_bounds = array<i64: 128, 128>}, {pipeline_mode = #tpu.pipeline_mode<synchronous>, transform_indices = @transform_4, window_bounds = array<i64: 1, 128>}, {transform_indices = @transform_5, window_bounds = array<i64: 16, 128>}]} {
    %c0 = arith.constant 0 : index
    %c0_0 = arith.constant 0 : index
    %0 = vector.load %arg1[%c0, %c0_0] : memref<16x16xf32, #tpu.memory_space<vmem>>, vector<16x16xf32>
    %c0_1 = arith.constant 0 : index
    %c0_2 = arith.constant 0 : index
    %1 = vector.load %arg2[%c0_1, %c0_2] : memref<16x128xf32, #tpu.memory_space<vmem>>, vector<16x128xf32>
    %cst = arith.constant dense<0.000000e+00> : vector<16x128xf32>
    %2 = tpu.matmul %0, %1, %cst {dimension_numbers = #tpu.dot_dimension_numbers<[1], [0], [0], [1], [0, 0, 1, 1], [], []>} : vector<16x16xf32>, vector<16x128xf32>, vector<16x128xf32> -> vector<16x128xf32>
    %c0_3 = arith.constant 0 : index
    %c0_4 = arith.constant 0 : index
    %3 = vector.load %arg3[%c0_3, %c0_4] : memref<1x128xf32, #tpu.memory_space<vmem>>, vector<1x128xf32>
    %4 = vector.broadcast %3 : vector<1x128xf32> to vector<16x128xf32>
    %5 = arith.addf %2, %4 : vector<16x128xf32>
    %6 = math.tanh %5 : vector<16x128xf32>
    %c0_5 = arith.constant 0 : index
    %c0_6 = arith.constant 0 : index
    %7 = vector.load %arg4[%c0_5, %c0_6] : memref<128x128xf32, #tpu.memory_space<vmem>>, vector<128x128xf32>
    %cst_7 = arith.constant dense<0.000000e+00> : vector<16x128xf32>
    %8 = tpu.matmul %6, %7, %cst_7 {dimension_numbers = #tpu.dot_dimension_numbers<[1], [0], [0], [1], [0, 0, 1, 1], [], []>} : vector<16x128xf32>, vector<128x128xf32>, vector<16x128xf32> -> vector<16x128xf32>
    %c0_8 = arith.constant 0 : index
    %c0_9 = arith.constant 0 : index
    %9 = vector.load %arg5[%c0_8, %c0_9] : memref<1x128xf32, #tpu.memory_space<vmem>>, vector<1x128xf32>
    %10 = vector.broadcast %9 : vector<1x128xf32> to vector<16x128xf32>
    %11 = arith.addf %8, %10 : vector<16x128xf32>
    %c0_10 = arith.constant 0 : index
    %c0_11 = arith.constant 0 : index
    %12 = vector.load %arg6[%c0_10, %c0_11] : memref<16x128xf32, #tpu.memory_space<vmem>>, vector<16x128xf32>
    tpu.vector_store %arg6[%c0_10, %c0_11], %11 {strides = array<i32>} : memref<16x128xf32, #tpu.memory_space<vmem>>, vector<16x128xf32>,
    return
  }
  func.func @transform_0(%arg0: i32) -> (i32, i32) {
    %c0_i32 = arith.constant 0 : i32
    %c0_i32_0 = arith.constant 0 : i32
    return %arg0, %c0_i32 : i32, i32
  }
  func.func @transform_1(%arg0: i32) -> (i32, i32) {
    %c0_i32 = arith.constant 0 : i32
    %c0_i32_0 = arith.constant 0 : i32
    %c0_i32_1 = arith.constant 0 : i32
    return %c0_i32, %c0_i32_0 : i32, i32
  }
  func.func @transform_2(%arg0: i32) -> (i32, i32) {
    %c0_i32 = arith.constant 0 : i32
    %c0_i32_0 = arith.constant 0 : i32
    %c0_i32_1 = arith.constant 0 : i32
    return %c0_i32, %c0_i32_0 : i32, i32
  }
  func.func @transform_3(%arg0: i32) -> (i32, i32) {
    %c0_i32 = arith.constant 0 : i32
    %c0_i32_0 = arith.constant 0 : i32
    %c0_i32_1 = arith.constant 0 : i32
    return %c0_i32, %c0_i32_0 : i32, i32
  }
  func.func @transform_4(%arg0: i32) -> (i32, i32) {
    %c0_i32 = arith.constant 0 : i32
    %c0_i32_0 = arith.constant 0 : i32
    %c0_i32_1 = arith.constant 0 : i32
    return %c0_i32, %c0_i32_0 : i32, i32
  }
  func.func @transform_5(%arg0: i32) -> (i32, i32) {
    %c0_i32 = arith.constant 0 : i32
    %c0_i32_0 = arith.constant 0 : i32
    return %arg0, %c0_i32 : i32, i32
  }
}

</mosaic_0001>

<bundles_post_ra>
// kernel: tpu_custom_call.1
= control target key start
LH: loop header
LB: loop body
LE: loop exit
PB: predicated region body
PF: predicated region fallthrough
CT: control target
= control target key end

     0   :  { %10 = vsyncpa [#allocation3], 0  ;;  %s926_s0 = inlined_call_operand.vmem [shape: f32[48,16], index: 0, kind: input, shape index: {}]   ;;  %s927_s1 = inlined_call_operand.vmem [shape: f32[16,128], index: 1, kind: input, shape index: {}]   ;;  %s928_s2 = inlined_call_operand.vmem [shape: f32[1,128], index: 2, kind: input, shape index: {}]   ;;  %s929_s3 = inlined_call_operand.hbm [shape: f32[128,128], index: 3, kind: input, shape index: {}]   ;;  %s930_s4 = inlined_call_operand.vmem [shape: f32[1,128], index: 4, kind: input, shape index: {}]   ;;  %s931_s5 = inlined_call_operand.hbm [shape: f32[48,128], index: 5, kind: output, shape index: {}]  }
   0x1   :  { %11 = vsyncpa [#allocation4], 0 }
   0x2   :  { %13 = vsyncpa [#allocation4 + $0x1], 0  ;;  %s793_s18 = smov 0   ;;  %s795_s19 = smov 0  }
   0x3   :  { %s797_s20 = smov 0   ;;  %s799_s21 = smov 0  }
   0x4 LB: > { %s814_s22 = sadd.s32 4294967295, %s755_s21   ;;  %s524_s23 = sadd.s32 4294967294, %s755_s21   ;;  %s755_s21 = sphi %s799_s21, %s939_s21   ;;  %s751_s20 = sphi %s797_s20, %s938_s20   ;;  %s747_s19 = sphi %s795_s19, %s937_s19   ;;  %s743_s18 = sphi %s793_s18, %s936_s18  }
   0x5   : > { %s818_s24 = sadd.s32 1, %s755_s21   ;;  %s136_s25 = sadd.s32 1, %s751_s20 }
   0x6   : > { %s133_s26 = ssub.s32 %s755_s21, %s818_s24  ;;  %p146_p0 = scmp.ne.s32.totalorder %s751_s20, %s747_s19 }
   0x7   : > { %p134_p1 = scmp.eq.s32.totalorder %s133_s26, 0  ;;  %p147_p2 = scmp.eq.s32.totalorder %s814_s22, 2 }
   0x8   : > { %p152_p3 = scmp.ne.s32.totalorder %s747_s19, %s743_s18  ;;  %p153_p4 = scmp.eq.s32.totalorder %s524_s23, 2 }
   0x9   : > { %s829_s27 = scalar_select %p134_p1, %s751_s20, %s136_s25  }
   0xa   : > { %p831_p5 = por %p147_p2, %p146_p0  ;;  %p835_p6 = por %p153_p4, %p152_p3 }
   0xb   : > { %p525_p7 = scmp.ge.s32.totalorder %s755_s21, 1  ;;  %p160_p8 = scmp.lt.s32.totalorder %s755_s21, 4 }
   0xc   : > { %s933_s29 = scalar_select %p835_p6, 1, 0 }
   0xd   : > { %p621_p9 = scmp.eq.s32.totalorder %s814_s22, 0  ;;  %p842_p10 = pnand %p525_p7, %p160_p8 }
   0xe   : > { %s757_s6 = smov [#allocation2]  }
   0xf   : > { %s178_s7 = sshll.u32 %s757_s6, 4  ;;  %p613_p11 = pneg %p842_p10  ;;  %s179_s7 = int_to_ptr.vmem [resolvable:$true] %s178_s7 }
  0x10   : > { %s676_s8 = scalar_lea.vmem %s179_s7, 2048  ;;  %p684_p3 = scmp.lt.s32.totalorder %s179_s7, %s179_s7 }
  0x11   : > { %p614_p12 = pnand %p621_p9, %p613_p11  ;;  %p677_p0 = scmp.ne.s32.totalorder %s179_s7, %s676_s8 }
  0x12   : > { %p685_p4 = scmp.lt.s32.totalorder %s676_s8, %s676_s8 }
  0x13   : > { %p667_p13 = pneg %p614_p12 }
  0x14   : > { %p686_p6 = por %p685_p4, %p684_p3 }
  0x15   : > { %p679_p1 = pnand %p677_p0, %p667_p13 }
  0x17   : > { %p680_p2 = pneg %p679_p1 }
  0x19   : > { %p687_p7 = pnand %p686_p6, %p680_p2 }
  0x1b   : > { %690 = shalt.err (!%p687_p7)
}
  0x1c   : > { %s758_s9 = smov 128   ;;  %s759_s10 = smov 8  }
  0x1d   : > { %616 = dma.hbm_to_vmem [thread:$0]  (!%p614_p12), %s929_s3, 2048, %s179_s7, [#allocation3], %s758_s9, %s758_s9, %s759_s10  }
  0x1e   : > { %206 = sbr.rel (%p842_p10) target bundleno = 467 (0x1d3), region = 40 }
  0x23   : > { %734 = dma.done.wait (%p621_p9), [#allocation3], 2048  }
  0x24   : > { %736 = vsyncadd (%p621_p9), [#allocation3], 4294965248  ;;  %s531_s13 = sshll.u32 %s814_s22, 1  ;;  %vm252_vm0 = vcmask 130048   ;;  %v244_v0 = vld [vmem:[%s927_s1 + $0x8] sm:$0xff]  ;;  %v243_v1 = vld [vmem:[%s927_s1] sm:$0xff] }
  0x25   : > { %p235_p8 = scmp.lt.s32.totalorder %s531_s13, 5  ;;  %565 = vmatprep.subr.mxu0 %v244_v0  ;;  %v351_v3 = vld [vmem:[#allocation2 + $0x78] sm:$0xff]  ;;  %v350_v4 = vld [vmem:[#allocation2 + $0x70] sm:$0xff]  ;;  %v349_v6 = vld [vmem:[#allocation2 + $0x68] sm:$0xff]  ;;  %s231_s8 = sand.u32 1, %s747_s19  }
  0x26   : > { %566 = vmatpush3.msra.mxu0 %v244_v0  ;;  %572 = vmatprep.subr.mxu1 %v351_v3  ;;  %v348_v7 = vld [vmem:[#allocation2 + $0x60] sm:$0xff]  ;;  %v347_v8 = vld [vmem:[#allocation2 + $0x58] sm:$0xff]  ;;  %v346_v9 = vld [vmem:[#allocation2 + $0x50] sm:$0xff]  ;;  %s530_s9 = sshll.u32 %s231_s8, 4  ;;  %s886_s23 = scalar_lea.sflag [#allocation4], %s231_s8 }
  0x27   : > { %s941_s13 = smov (!%p235_p8, %s531_s13), 5  ;;  %567 = vmatprep.subr.mxu0 %v243_v1  ;;  %573 = vmatpush3.msra.mxu1 %v351_v3  ;;  %v345_v10 = vld [vmem:[#allocation2 + $0x48] sm:$0xff]  ;;  %v344_v11 = vld [vmem:[#allocation2 + $0x40] sm:$0xff]  ;;  %v343_v12 = vld [vmem:[#allocation2 + $0x38] sm:$0xff]  ;;  %s233_s12 = scalar_lea.vmem [#allocation5], %s530_s9 }
  0x28   : > { %s532_s14 = sshll.u32 %s941_s13, 3  ;;  %568 = vmatpush3.msra.mxu0 %v243_v1  ;;  %574 = vmatprep.subr.mxu1 %v350_v4  ;;  %v342_v13 = vld [vmem:[#allocation2 + $0x30] sm:$0xff]  ;;  %v341_v14 = vld [vmem:[#allocation2 + $0x28] sm:$0xff]  ;;  %v340_v15 = vld [vmem:[#allocation2 + $0x20] sm:$0xff]  ;;  %s450_s13 = sshll.u32 %s233_s12, 4  ;;  %s879_s13 = int_to_ptr.vmem [resolvable:$true] %s450_s13 }
  0x29   : > { %s238_s17 = scalar_lea.vmem %s926_s0, %s532_s14  ;;  %575 = vmatpush3.msra.mxu1 %v350_v4  ;;  %v339_v16 = vld [vmem:[#allocation2 + $0x18] sm:$0xff]  ;;  %v338_v17 = vld [vmem:[#allocation2 + $0x10] sm:$0xff]  ;;  %v337_v18 = vld [vmem:[#allocation2 + $0x8] sm:$0xff]  ;;  %s542_s14 = sshll.u32 %s814_s22, 8 }
  0x2a   : > { %v241_v2 = vld [vmem:[%s238_s17] sm:$0xff]  ;;  %v242_v5 = vld [vmem:[%s238_s17 + $0x8] sm:$0xff]  ;;  %576 = vmatprep.subr.mxu1 %v349_v6  ;;  %s884_s17 = scalar_lea.hbm %s931_s5, %s542_s14  ;;  %s691_s25 = scalar_lea.vmem %s879_s13, 256 }
  0x2b   : > { %569 = vmatprep.mubr.msk.f32.mxu0 %vm252_vm0, %v241_v2  ;;  %577 = vmatpush3.msra.mxu1 %v349_v6  ;;  %v336_v19 = vld [vmem:[#allocation2] sm:$0xff]  ;;  %p692_p6 = scmp.ne.s32.totalorder %s879_s13, %s691_s25  ;;  %s760_s22 = smov [#allocation5]  }
  0x2c   : > { %570 = vmatmul.mubr.msk.f32.vlgmr.msra.gmra.mxu0 %vm252_vm0, %v242_v5  ;;  %578 = vmatprep.subr.mxu1 %v348_v7  ;;  %v533_v20 = vld [vmem:[%s928_s2] ss:$0 sm:$0xff]  ;;  %s695_s26 = sshll.u32 %s760_s22, 4  ;;  %s696_s26 = int_to_ptr.vmem [resolvable:$false] %s695_s26 }
  0x2d   : > { %579 = vmatpush3.msra.mxu1 %v348_v7  ;;  %v536_v27 = vld [vmem:[%s930_s4] ss:$0 sm:$0xff]  ;;  %p693_p9 = pnand %p692_p6, %p831_p5  ;;  %s697_s30 = scalar_lea.vmem %s696_s26, 512 }
  0x2e   : > { %580 = vmatprep.subr.mxu1 %v347_v8  ;;  %p698_p11 = scmp.lt.s32.totalorder %s879_s13, %s696_s26  ;;  %p699_p12 = scmp.lt.s32.totalorder %s697_s30, %s691_s25 }
  0x2f   : > { %581 = vmatpush3.msra.mxu1 %v347_v8  ;;  %p694_p10 = pneg %p693_p9 }
  0x30   : > { %582 = vmatprep.subr.mxu1 %v346_v9  ;;  %p700_p13 = por %p699_p12, %p698_p11 }
  0x31   : > { %583 = vmatpush3.msra.mxu1 %v346_v9 }
  0x32   : > { %584 = vmatprep.subr.mxu1 %v345_v10  ;;  %p701_p0 = pnand %p700_p13, %p694_p10 }
  0x33   : > { %585 = vmatpush3.msra.mxu1 %v345_v10 }
  0x34   : > { %586 = vmatprep.subr.mxu1 %v344_v11 }
  0x35   : > { %587 = vmatpush3.msra.mxu1 %v344_v11 }
  0x36   : > { %588 = vmatprep.subr.mxu1 %v343_v12 }
  0x37   : > { %589 = vmatpush3.msra.mxu1 %v343_v12 }
  0x38   : > { %590 = vmatprep.subr.mxu1 %v342_v13 }
  0x39   : > { %591 = vmatpush3.msra.mxu1 %v342_v13 }
  0x3a   : > { %592 = vmatprep.subr.mxu1 %v341_v14 }
  0x3b   : > { %593 = vmatpush3.msra.mxu1 %v341_v14 }
  0x3c   : > { %594 = vmatprep.subr.mxu1 %v340_v15 }
  0x3d   : > { %595 = vmatpush3.msra.mxu1 %v340_v15 }
  0x3e   : > { %596 = vmatprep.subr.mxu1 %v339_v16 }
  0x3f   : > { %597 = vmatpush3.msra.mxu1 %v339_v16 }
  0x40   : > { %598 = vmatprep.subr.mxu1 %v338_v17 }
  0x41   : > { %599 = vmatpush3.msra.mxu1 %v338_v17 }
  0x42   : > { %600 = vmatprep.subr.mxu1 %v337_v18 }
  0x43   : > { %601 = vmatpush3.msra.mxu1 %v337_v18 }
  0x44   : > { %602 = vmatprep.subr.mxu1 %v336_v19 }
  0x45   : > { %603 = vmatpush3.msra.mxu1 %v336_v19 }
  0xec   : > { %v571_v21 = vpop.f32.mrf.mxu0 }
  0xed   : > { %v331_v22 = vadd.f32 %v571_v21, %v533_v20 }
  0xee   : > { %v325_v23 = vpop.f32.mrf.mxu0 }
  0xef   : > { %v326_v24 = vadd.f32 %v533_v20, %v325_v23 }
  0xf1   : > { %661 = vtanh.f32 %v326_v24 }
  0xf2   : > { %663 = vtanh.f32 %v331_v22 }
  0xfe   : > { %v662_v25 = vpop.eup %661 }
  0xff   : > { %v664_v26 = vpop.eup %663  ;;  %604 = vmatprep.mubr.f32.mxu1 %v662_v25 }
 0x100   : > { %605 = vmatmul.mubr.f32.vlgmr.msra.gmra.mxu1 %v664_v26 }
 0x1c0   : > { %v606_v28 = vpop.f32.mrf.mxu1 }
 0x1c1   : > { %v431_v29 = vadd.f32 %v606_v28, %v536_v27 }
 0x1c2   : > { %v425_v30 = vpop.f32.mrf.mxu1 }
 0x1c3   : > { %435 = vst [vmem:[%s233_s12 + $0x8] sm:$0xff] %v431_v29  ;;  %v426_v31 = vadd.f32 %v536_v27, %v425_v30 }
 0x1c5   : > { %434 = vst [vmem:[%s233_s12] sm:$0xff] %v426_v31 }
 0x1c6   : > { %704 = shalt.err (!%p701_p0)
}
 0x1c7   : > { %s705_s6 = scalar_lea.hbm %s884_s17, 256  ;;  %s709_s9 = scalar_lea.hbm %s931_s5, 768 }
 0x1c8   : > { %p706_p1 = scmp.ne.s32.totalorder %s884_s17, %s705_s6  ;;  %p710_p4 = scmp.lt.s32.totalorder %s884_s17, %s931_s5 }
 0x1c9   : > { %p711_p7 = scmp.lt.s32.totalorder %s709_s9, %s705_s6 }
 0x1ca   : > { %p707_p2 = pnand %p706_p1, %p831_p5 }
 0x1cb   : > { %p712_p8 = por %p711_p7, %p710_p4 }
 0x1cc   : > { %p708_p3 = pneg %p707_p2 }
 0x1ce   : > { %p713_p6 = pnand %p712_p8, %p708_p3 }
 0x1d0   : > { %716 = shalt.err (!%p713_p6)
}
 0x1d1   : > { %s761_s12 = smov 128   ;;  %s762_s14 = smov 8  }
 0x1d2   : > { %611 = dma.vmem_to_hbm [thread:$0]  (%p831_p5), %s879_s13, 256, %s884_s17, %s886_s23, %s761_s12, %s761_s12, %s762_s14  }
 0x1d3 PF: > { %p623_p9 = scmp.ge.s32.totalorder %s755_s21, 2  ;;  %s465_s15 = sand.u32 1, %s743_s18  }
 0x1d4   : > { %p935_p10 = scmp.ne.s32.totalorder %s933_s29, 0  ;;  %s466_s16 = scalar_lea.sflag [#allocation4], %s465_s15 }
 0x1d6   : > { %p618_p11 = pnand %p623_p9, %p935_p10 }
 0x1d8   : > { %p619_p12 = pneg %p618_p11 }
 0x1da   : > { %738 = dma.done.wait (%p619_p12), %s466_s16, 256  }
 0x1db   : > { %740 = vsyncadd (%p619_p12), %s466_s16, 4294967040  ;;  %p16_p13 = scmp.ge.s32.totalorder %s818_s24, 5   ;;  %s936_s18 = smov %s747_s19 }
 0x1dc   : > { %s937_s19 = smov %s751_s20  ;;  %s938_s20 = smov %s829_s27 }
 0x1dd   : > { %s939_s21 = smov %s818_s24  ;;  %18 = sbr.rel (!%p16_p13) target bundleno = 4 (0x4), region = 80 }
 0x1e2   :  { %471 = vsyncpa [#allocation3], 1 }
 0x1e3   :  { %473 = vsyncpa [#allocation3 + $0x1], 1 }
 0x1e4   :  { %474 = vsyncpa [#allocation4], 1 }
 0x1e5   :  { %476 = vsyncpa [#allocation4 + $0x1], 1 }

</bundles_post_ra>
